<compile_context>
chip_gen: v7x
topology: tpu7x:2x2x1
jax: 0.10.0
libtpu: 0.0.40
codegen_flags: <defaults>
</compile_context>

<pallas_src>
import functools

import jax
import jax.numpy as jnp
from jax.experimental import pallas as pl
from jax.experimental.pallas import tpu as pltpu

_LANE_WIDTHS = (1024, 512, 256, 128)   # candidate lane-dense slab widths
_FALLBACK_W = 128                      # width for the non-divisible fallback
_MAX_CHUNKS = 512                      # caps in-kernel unroll (block_rows <= 8*this)


@functools.lru_cache(maxsize=1)
def _is_v7x() -> bool:
    try:
        return "v7" in jax.devices()[0].device_kind.lower()
    except Exception:  # pragma: no cover - conservative default
        return False


def _sse_kernel(x_ref, y_ref, out_ref, acc_ref, *, rows, num_blocks,
                chunked, partial_last, over_cover):
    # x_ref, y_ref: (block_rows, w) VMEM tiles (input dtype, upcast in-kernel)
    # out_ref:      (1, 8, 128) lane-dense f32 block, one per split
    # acc_ref:      (8, w) f32 scratch (or (block_rows, w) for tiny blocks)
    c = pl.program_id(0)               # split index ("parallel", v7x megacore)
    i = pl.program_id(1)               # step within split ("arbitrary")
    steps = pl.num_programs(1)
    blk = c * steps + i                # logical block index
    last_blk = num_blocks - 1
    br, w = x_ref.shape

    @pl.when(i == 0)
    def _():
        acc_ref[...] = jnp.zeros_like(acc_ref)

    def sq_chunk(sl):
        d = (x_ref[sl, :].astype(jnp.float32)
             - y_ref[sl, :].astype(jnp.float32))
        return d * d

    def accumulate_full():
        if chunked:
            # Fold the (br, w) tile into an (8, w) register-resident partial:
            # no full-tile f32 temporaries, no per-chunk acc load/store.
            part = jnp.zeros((8, w), jnp.float32)
            for g in range(br // 8):
                part = part + sq_chunk(slice(g * 8, (g + 1) * 8))
            acc_ref[...] += part
        else:
            acc_ref[...] += sq_chunk(slice(None))

    def accumulate_partial_last():
        # Boundary block only: `vr` valid rows, the rest is OOB padding.
        vr = rows - last_blk * br          # static Python int, 0 < vr < br
        part = jnp.zeros((8, w), jnp.float32)
        for g in range(-(-vr // 8)):       # only chunks holding valid rows
            lo = g * 8
            sq = sq_chunk(slice(lo, lo + 8))
            if lo + 8 > vr:                # the single straddling chunk
                rowi = jax.lax.broadcasted_iota(jnp.int32, (8, w), 0)
                sq = jnp.where(rowi < (vr - lo), sq, 0.0)
            part = part + sq
        acc_ref[...] += part

    if partial_last:
        @pl.when(blk < last_blk)
        def _():
            accumulate_full()

        @pl.when(blk == last_blk)
        def _():
            accumulate_partial_last()
    elif over_cover:
        @pl.when(blk <= last_blk)          # skip clamped duplicate blocks
        def _():
            accumulate_full()
    else:
        accumulate_full()

    @pl.when(i == steps - 1)
    def _():
        # single cross-lane reduce per split, lane-dense output write
        out_ref[...] = jnp.full(out_ref.shape, jnp.sum(acc_ref[...]),
                                jnp.float32)


def _sse_2d(x2, y2):
    """Sum of squared differences of two equal-shape (rows, w) arrays."""
    rows, w = x2.shape
    x_item = x2.dtype.itemsize
    y_item = y2.dtype.itemsize
    itemsize = max(x_item, y_item)
    is_v7 = _is_v7x()

    # Byte-based, dtype-aware tile cap (larger on v7x: faster HBM, 2 TCs).
    max_block_bytes = (8 << 20) if is_v7 else (4 << 20)
    cap_rows = max(8, min(max_block_bytes // (w * itemsize), 8 * _MAX_CHUNKS))

    if rows < 8:
        block_rows = rows                         # tiny: one unchunked block
    else:
        block_rows = min(cap_rows, (rows // 8) * 8)
    chunked = block_rows >= 8 and block_rows % 8 == 0

    num_blocks = -(-rows // block_rows)
    partial_last = (rows % block_rows) != 0       # implies chunked
    # Split across the two TensorCores only on v7x; on 1-TC chips a split is
    # just a serial partition that adds a duplicated clamped block.
    splits = 2 if (is_v7 and num_blocks >= 2) else 1
    steps = -(-num_blocks // splits)
    over_cover = splits * steps > num_blocks
    last_blk = num_blocks - 1

    acc_rows = 8 if chunked else block_rows

    def in_map(c, i):
        # Clamp so every DMA stays in bounds; over-covered duplicate blocks
        # are skipped inside the kernel.
        return (jnp.minimum(c * steps + i, last_blk), 0)

    # VMEM budget: 2 double-buffered input tiles + small accumulator + margin.
    block_in_bytes = block_rows * w * (x_item + y_item)
    vmem_need = 2 * block_in_bytes + acc_rows * w * 4 + (1 << 20)
    vmem_limit = int(min(max(vmem_need + (2 << 20), 16 << 20), 48 << 20))

    cost = pl.CostEstimate(
        flops=3 * rows * w,
        transcendentals=0,
        bytes_accessed=rows * w * (x_item + y_item) + splits * 8 * 128 * 4)

    out = pl.pallas_call(
        functools.partial(_sse_kernel, rows=rows, num_blocks=num_blocks,
                          chunked=chunked, partial_last=partial_last,
                          over_cover=over_cover),
        out_shape=jax.ShapeDtypeStruct((splits, 8, 128), jnp.float32),
        grid_spec=pltpu.PrefetchScalarGridSpec(
            num_scalar_prefetch=0,
            grid=(splits, steps),
            in_specs=[
                pl.BlockSpec((block_rows, w), in_map),
                pl.BlockSpec((block_rows, w), in_map),
            ],
            out_specs=pl.BlockSpec((1, 8, 128), lambda c, i: (c, 0, 0)),
            scratch_shapes=[pltpu.VMEM((acc_rows, w), jnp.float32)],
        ),
        compiler_params=pltpu.CompilerParams(
            dimension_semantics=("parallel", "arbitrary"),
            vmem_limit_bytes=vmem_limit),
        cost_estimate=cost,
    )(x2, y2)

    return jnp.sum(out[:, 0, 0])      # per-split partial sums


@jax.jit
def _generator_mse_loss(x, y, bias):
    n = x.size

    xf = x.reshape(-1)                # free reshape of a contiguous array
    yf = y.reshape(-1)

    # Widest lane-dense slab width in {1024..128} dividing n -> no copies.
    w = None
    for cand in _LANE_WIDTHS:
        if n % cand == 0:
            w = cand
            break

    if w is not None:
        sse = _sse_2d(xf.reshape(n // w, w), yf.reshape(n // w, w))
    else:
        # Non-128-divisible: kernel over the 128-aligned prefix, tiny jnp
        # reduction for the <128-element tail (avoids jnp.pad full copies).
        main = (n // _FALLBACK_W) * _FALLBACK_W
        sse = jnp.float32(0.0)
        if main:
            sse = _sse_2d(xf[:main].reshape(main // _FALLBACK_W, _FALLBACK_W),
                          yf[:main].reshape(main // _FALLBACK_W, _FALLBACK_W))
        td = xf[main:].astype(jnp.float32) - yf[main:].astype(jnp.float32)
        sse = sse + jnp.sum(td * td)

    return sse * jnp.float32(1.0 / n) + bias


class GeneratorLoss:
    """JAX/Pallas port of dlwp GeneratorLoss with an MSE inner loss."""

    def __init__(self, disc_score_weight: float):
        self.disc_score_weight = jnp.float32(disc_score_weight)

    def __call__(self, inputs, targets, disc_score):
        if disc_score is None:
            bias = jnp.float32(0.0)
        else:
            bias = self.disc_score_weight * jnp.asarray(
                disc_score, jnp.float32).reshape(())
        return _generator_mse_loss(inputs, targets, bias)


if __name__ == "__main__":
    key = jax.random.PRNGKey(0)
    keys = jax.random.split(key, 12)

    disc_score_weight = 0.2
    dsw = jnp.float32(disc_score_weight)
    mod = GeneratorLoss(disc_score_weight)

    # --- small NCHW case: batch=2, channels=4, spatial=16x16 ----------------
    x = jax.random.normal(keys[0], (2, 4, 16, 16), dtype=jnp.float32)
    y = jax.random.normal(keys[1], (2, 4, 16, 16), dtype=jnp.float32)
    disc_score = jax.random.normal(keys[2], (), dtype=jnp.float32)

    out = mod(x, y, disc_score)
    jax.block_until_ready(out)
    ref = jnp.mean((x - y) ** 2) + dsw * disc_score
    assert jnp.allclose(out, ref, rtol=1e-5, atol=1e-5), (out, ref)

    out_none = mod(x, y, None)
    jax.block_until_ready(out_none)
    ref_none = jnp.mean((x - y) ** 2)
    assert jnp.allclose(out_none, ref_none, rtol=1e-5, atol=1e-5), (
        out_none, ref_none)

    # --- bf16 inputs (dtype-aware tile cap, in-kernel upcast) ----------------
    xb = x.astype(jnp.bfloat16)
    yb = y.astype(jnp.bfloat16)
    out_b = mod(xb, yb, disc_score)
    jax.block_until_ready(out_b)
    ref_b = jnp.mean((xb.astype(jnp.float32) - yb.astype(jnp.float32)) ** 2
                     ) + dsw * disc_score
    assert jnp.allclose(out_b, ref_b, rtol=1e-4, atol=1e-5), (out_b, ref_b)

    # --- non-128-divisible case (aligned-prefix kernel + jnp tail) ----------
    xo = jax.random.normal(keys[3], (2, 3, 17, 19), dtype=jnp.float32)
    yo = jax.random.normal(keys[4], (2, 3, 17, 19), dtype=jnp.float32)
    out_o = mod(xo, yo, disc_score)
    jax.block_until_ready(out_o)
    ref_o = jnp.mean((xo - yo) ** 2) + dsw * disc_score
    assert jnp.allclose(out_o, ref_o, rtol=1e-5, atol=1e-5), (out_o, ref_o)

    # --- medium non-divisible case (fallback path, boundary masking) --------
    xm = jax.random.normal(keys[5], (5, 4, 181, 151), dtype=jnp.float32)
    ym = jax.random.normal(keys[6], (5, 4, 181, 151), dtype=jnp.float32)
    out_m = mod(xm, ym, disc_score)
    jax.block_until_ready(out_m)
    ref_m = jnp.mean((xm - ym) ** 2) + dsw * disc_score
    assert jnp.allclose(out_m, ref_m, rtol=1e-4, atol=1e-5), (out_m, ref_m)

    # --- multi-block case (pipelined grid + chunked accumulate) -------------
    xl = jax.random.normal(keys[7], (16, 8, 128, 128), dtype=jnp.float32)
    yl = jax.random.normal(keys[8], (16, 8, 128, 128), dtype=jnp.float32)
    out_l = mod(xl, yl, disc_score)
    jax.block_until_ready(out_l)
    ref_l = jnp.mean((xl - yl) ** 2) + dsw * disc_score
    assert jnp.allclose(out_l, ref_l, rtol=1e-4, atol=1e-5), (out_l, ref_l)

    # --- partial boundary block (masked last block only) --------------------
    xp = jax.random.normal(keys[9], (3, 1024, 353), dtype=jnp.float32)
    yp = jax.random.normal(keys[10], (3, 1024, 353), dtype=jnp.float32)
    out_p = mod(xp, yp, disc_score)
    jax.block_until_ready(out_p)
    ref_p = jnp.mean((xp - yp) ** 2) + dsw * disc_score
    assert jnp.allclose(out_p, ref_p, rtol=1e-4, atol=1e-5), (out_p, ref_p)

    print("KERNEL_OK")
</pallas_src>

<mosaic_0001>
module attributes {stable_mosaic.version = 11 : i64} {
  func.func @_sse_kernel(%arg0: i32, %arg1: i32, %arg2: memref<2x1024xf32, #tpu.memory_space<vmem>>, %arg3: memref<2x1024xf32, #tpu.memory_space<vmem>>, %arg4: memref<1x8x128xf32, #tpu.memory_space<vmem>>, %arg5: memref<2x1024xf32, #tpu.memory_space<vmem>>) attributes {dimension_semantics = [#tpu.dimension_semantics<parallel>, #tpu.dimension_semantics<arbitrary>], iteration_bounds = array<i64: 1, 1>, scalar_prefetch = 0 : i64, scratch_operands = 1 : i64, tpu.core_type = #tpu.core_type<tc>, window_params = [{transform_indices = @transform_0, window_bounds = array<i64: 2, 1024>}, {transform_indices = @transform_1, window_bounds = array<i64: 2, 1024>}, {transform_indices = @transform_2, window_bounds = array<i64: 1, 8, 128>}]} {
    %c0_i32 = arith.constant 0 : i32
    %0 = arith.cmpi eq, %arg1, %c0_i32 : i32
    %1 = arith.extui %0 : i1 to i32
    %c0_i32_0 = arith.constant 0 : i32
    %2 = arith.cmpi ne, %1, %c0_i32_0 : i32
    scf.if %2 {
      %cst = arith.constant 0.000000e+00 : f32
      %13 = vector.broadcast %cst : f32 to vector<2x1024xf32>
      %c0_10 = arith.constant 0 : index
      %c0_11 = arith.constant 0 : index
      %14 = vector.load %arg5[%c0_10, %c0_11] : memref<2x1024xf32, #tpu.memory_space<vmem>>, vector<2x1024xf32>
      tpu.vector_store %arg5[%c0_10, %c0_11], %13 {strides = array<i32>} : memref<2x1024xf32, #tpu.memory_space<vmem>>, vector<2x1024xf32>,
    } else {
    }
    %c0 = arith.constant 0 : index
    %c0_1 = arith.constant 0 : index
    %3 = vector.load %arg5[%c0, %c0_1] : memref<2x1024xf32, #tpu.memory_space<vmem>>, vector<2x1024xf32>
    %c0_2 = arith.constant 0 : index
    %c0_3 = arith.constant 0 : index
    %4 = vector.load %arg2[%c0_2, %c0_3] : memref<2x1024xf32, #tpu.memory_space<vmem>>, vector<2x1024xf32>
    %c0_4 = arith.constant 0 : index
    %c0_5 = arith.constant 0 : index
    %5 = vector.load %arg3[%c0_4, %c0_5] : memref<2x1024xf32, #tpu.memory_space<vmem>>, vector<2x1024xf32>
    %6 = arith.subf %4, %5 : vector<2x1024xf32>
    %7 = arith.mulf %6, %6 : vector<2x1024xf32>
    %8 = arith.addf %3, %7 : vector<2x1024xf32>
    %c0_6 = arith.constant 0 : index
    %c0_7 = arith.constant 0 : index
    %9 = vector.load %arg5[%c0_6, %c0_7] : memref<2x1024xf32, #tpu.memory_space<vmem>>, vector<2x1024xf32>
    tpu.vector_store %arg5[%c0_6, %c0_7], %8 {strides = array<i32>} : memref<2x1024xf32, #tpu.memory_space<vmem>>, vector<2x1024xf32>,
    %c0_i32_8 = arith.constant 0 : i32
    %10 = arith.cmpi eq, %arg1, %c0_i32_8 : i32
    %11 = arith.extui %10 : i1 to i32
    %c0_i32_9 = arith.constant 0 : i32
    %12 = arith.cmpi ne, %11, %c0_i32_9 : i32
    scf.if %12 {
      %c0_10 = arith.constant 0 : index
      %c0_11 = arith.constant 0 : index
      %13 = vector.load %arg5[%c0_10, %c0_11] : memref<2x1024xf32, #tpu.memory_space<vmem>>, vector<2x1024xf32>
      %14 = vector.shape_cast %13 : vector<2x1024xf32> to vector<1x2x1024xf32>
      %cst = arith.constant dense<0.000000e+00> : vector<1xf32>
      %15 = vector.multi_reduction <add>, %14, %cst [1, 2] : vector<1x2x1024xf32> to vector<1xf32>
      %16 = vector.shape_cast %15 : vector<1xf32> to vector<1x1x1xf32>
      %17 = vector.extract %16[0, 0, 0] : f32 from vector<1x1x1xf32>
      %18 = vector.broadcast %17 : f32 to vector<1x8x128xf32>
      %c0_12 = arith.constant 0 : index
      %c0_13 = arith.constant 0 : index
      %c0_14 = arith.constant 0 : index
      %19 = vector.load %arg4[%c0_12, %c0_13, %c0_14] : memref<1x8x128xf32, #tpu.memory_space<vmem>>, vector<1x8x128xf32>
      tpu.vector_store %arg4[%c0_12, %c0_13, %c0_14], %18 {strides = array<i32>} : memref<1x8x128xf32, #tpu.memory_space<vmem>>, vector<1x8x128xf32>,
    } else {
    }
    return
  }
  func.func @transform_0(%arg0: i32, %arg1: i32) -> (i32, i32) {
    %c1_i32 = arith.constant 1 : i32
    %0 = arith.muli %arg0, %c1_i32 : i32
    %1 = arith.addi %0, %arg1 : i32
    %c0_i32 = arith.constant 0 : i32
    %2 = arith.minsi %1, %c0_i32 : i32
    %c0_i32_0 = arith.constant 0 : i32
    %c0_i32_1 = arith.constant 0 : i32
    return %2, %c0_i32_0 : i32, i32
  }
  func.func @transform_1(%arg0: i32, %arg1: i32) -> (i32, i32) {
    %c1_i32 = arith.constant 1 : i32
    %0 = arith.muli %arg0, %c1_i32 : i32
    %1 = arith.addi %0, %arg1 : i32
    %c0_i32 = arith.constant 0 : i32
    %2 = arith.minsi %1, %c0_i32 : i32
    %c0_i32_0 = arith.constant 0 : i32
    %c0_i32_1 = arith.constant 0 : i32
    return %2, %c0_i32_0 : i32, i32
  }
  func.func @transform_2(%arg0: i32, %arg1: i32) -> (i32, i32, i32) {
    %c0_i32 = arith.constant 0 : i32
    %c0_i32_0 = arith.constant 0 : i32
    %c0_i32_1 = arith.constant 0 : i32
    return %arg0, %c0_i32, %c0_i32_0 : i32, i32, i32
  }
}

</mosaic_0001>

<bundles_post_ra>
// kernel: _generator_mse_loss.1
= control target key start
LH: loop header
LB: loop body
LE: loop exit
PB: predicated region body
PF: predicated region fallthrough
CT: control target
= control target key end

     0   :  { %v102_v0 = vlaneseq  ;;  %v186_v4 = vmov 1983009808   ;;  %vm140_vm0 = vcmask 1041408   ;;  %s225_s0 = inlined_call_operand.vmem [shape: f32[2,1024], index: 0, kind: input, shape index: {}]   ;;  %s226_s1 = inlined_call_operand.vmem [shape: f32[2,1024], index: 1, kind: input, shape index: {}]   ;;  %s227_s2 = inlined_call_operand.vmem [shape: f32[1,8,128], index: 2, kind: output, shape index: {}]  }
   0x1   :  { %v79_v1 = vld [vmem:[%s225_s0] sm:$0xff]  ;;  %v80_v2 = vld [vmem:[%s225_s0 + $0x8] sm:$0xff]  ;;  %v100_v5 = vunpack.c.l.s4 %v186_v4 }
   0x2   :  { %v81_v3 = vld [vmem:[%s226_s1] sm:$0xff]  ;;  %v82_v6 = vld [vmem:[%s226_s1 + $0x8] sm:$0xff]  ;;  %v103_v8 = vshrl.u32 %v102_v0, 7 }
   0x3   :  { %v83_v7 = vsub.f32 %v79_v1, %v81_v3  ;;  %v84_v9 = vsub.f32 %v80_v2, %v82_v6  ;;  %v101_v10 = vunpack.c.0.s8 %v100_v5 }
   0x5   :  { %v85_v11 = vmul.f32 %v83_v7, %v83_v7  ;;  %v86_v12 = vmul.f32 %v84_v9, %v84_v9  ;;  %v104_v13 = vsub.s32 %v101_v10, %v103_v8 }
   0x7   :  { %v98_v14 = vcombine.high %v85_v11, %v85_v11  ;;  %v105_v15 = vrot.slane %v85_v11, %v104_v13  ;;  %v115_v18 = vcombine.high %v86_v12, %v86_v12  ;;  %v122_v19 = vrot.slane %v86_v12, %v104_v13 }
   0x9   :  { %v112_v16 = vrot.slane %v98_v14, %v104_v13  ;;  %v113_v17 = vcombine.high %v105_v15, %v105_v15  ;;  %v141_v20 = vsel %vm140_vm0, %v105_v15, 0.0  ;;  %v129_v25 = vrot.slane %v115_v18, %v104_v13 }
   0xa   :  { %v130_v26 = vcombine.high %v122_v19, %v122_v19  ;;  %v148_v29 = vsel %vm140_vm0, %v122_v19, 0.0 }
   0xb   :  { %v114_v21 = vcombine.high %v112_v16, %v112_v16  ;;  %v142_v22 = vsel %vm140_vm0, %v113_v17, 0.0  ;;  %v144_v23 = vsel %vm140_vm0, %v112_v16, 0.0  ;;  %v131_v31 = vcombine.high %v129_v25, %v129_v25 }
   0xc   :  { %v143_v24 = vadd.f32 %v142_v22, %v141_v20  ;;  %v150_v32 = vsel %vm140_vm0, %v130_v26, 0.0  ;;  %v152_v34 = vsel %vm140_vm0, %v129_v25, 0.0 }
   0xd   :  { %v146_v27 = vsel %vm140_vm0, %v114_v21, 0.0  ;;  %v154_v36 = vsel %vm140_vm0, %v131_v31, 0.0 }
   0xe   :  { %v145_v28 = vadd.f32 %v144_v23, %v143_v24 }
  0x10   :  { %v147_v30 = vadd.f32 %v146_v27, %v145_v28 }
  0x12   :  { %v149_v33 = vadd.f32 %v148_v29, %v147_v30 }
  0x14   :  { %v151_v35 = vadd.f32 %v150_v32, %v149_v33 }
  0x16   :  { %v153_v37 = vadd.f32 %v152_v34, %v151_v35 }
  0x18   :  { %v155_v38 = vadd.f32 %v154_v36, %v153_v37 }
  0x1a   :  { %156 = vadd.xlane.f32.xlu0 %v155_v38 }
  0xa7   :  { %v157_v39 = vpop.xlane.xlu0 %156 }
  0xa8   :  { %v158_v40 = vrot.slane %v157_v39, 4 }
  0xaa   :  { %v159_v41 = vadd.f32 %v158_v40, %v157_v39 }
  0xac   :  { %v160_v42 = vrot.slane %v159_v41, 2 }
  0xae   :  { %v161_v43 = vadd.f32 %v160_v42, %v159_v41 }
  0xb0   :  { %v162_v44 = vrot.slane %v161_v43, 1 }
  0xb2   :  { %v163_v45 = vadd.f32 %v162_v44, %v161_v43 }
  0xb4   :  { %183 = vpush %v163_v45 }
  0xe5   :  { %s184_s0 = spop %183 }
  0xe6   :  { %v165_v46 = vstv %s184_s0 }
  0xe7   :  { %166 = vst [vmem:[%s227_s2] sm:$0xff] %v165_v46 }

</bundles_post_ra>
